<compile_context>
chip_gen: v7x
topology: tpu7x:2x2x1
jax: 0.10.0
libtpu: 0.0.40
codegen_flags: <defaults>
</compile_context>

<pallas_src>
import functools
import math

import jax
import jax.numpy as jnp
from jax.experimental import pallas as pl
from jax.experimental.pallas import tpu as pltpu

_EPS = 1e-5
_LANE = 1024


def _round_up(x, m):
    return ((x + m - 1) // m) * m


def _round_down(x, m):
    return (x // m) * m


@functools.lru_cache(maxsize=1)
def _big_vmem_tier():
    """True on v6e / v7x (32 MiB default scoped VMEM) -> larger streaming tiles."""
    try:
        kind = jax.devices()[0].device_kind.lower()
    except Exception:
        return False
    return any(tag in kind for tag in ("v6", "v7", "7x"))


# ---------------------------------------------------------------------------
# Kernel 1: per-block partial sums of target * log(pred + eps)  (mean / sum)
# ---------------------------------------------------------------------------
def _nll_partial_sum_kernel(pred_ref, targ_ref, out_ref, *, rows_total, need_mask):
    # pred/targ block: (tile_r, cols); out block: (out_rows, out_lanes).
    # Processed in out_rows-row chunks so the live vreg set stays small
    # (no full-tile f32 intermediate -> no spill).  Rows past `rows_total`
    # (overhanging last block) are masked to zero in-kernel.
    tile_r, cols = pred_ref.shape
    out_rows, out_lanes = out_ref.shape          # out_rows divides tile_r
    acc = jnp.zeros((out_rows, cols), jnp.float32)
    if need_mask:
        base = pl.program_id(0) * tile_r
        row_iota = jax.lax.broadcasted_iota(jnp.int32, (out_rows, cols), 0)
    for off in range(0, tile_r, out_rows):       # static, unrolled chunk loop
        p = pred_ref[off:off + out_rows, :].astype(jnp.float32)
        t = targ_ref[off:off + out_rows, :].astype(jnp.float32)
        val = t * jnp.log(p + _EPS)
        if need_mask:
            val = jnp.where(row_iota < (rows_total - off) - base, val, 0.0)
        acc = acc + val
    if out_lanes == 1:
        # Ragged lane width: collapse lanes (XLU reduce; tiny writeback).
        out_ref[...] = jnp.sum(acc, axis=1, keepdims=True)
    else:
        # Fold 128-lane groups with pure per-lane VPU adds (unmasked stores).
        folded = acc[:, :out_lanes]
        for g in range(1, cols // out_lanes):
            folded = folded + acc[:, g * out_lanes:(g + 1) * out_lanes]
        out_ref[...] = folded


# ---------------------------------------------------------------------------
# Kernel 2: per-pixel channel-summed loss (reduction='none')
# ---------------------------------------------------------------------------
def _nll_none_kernel(pred_ref, targ_ref, out_ref):
    # pred/targ block: (b_tile, C, hw_tile); out block: (b_tile, 1, hw_tile).
    # Compute chunked over (channel-group x lane-chunk): ~8K f32 elems live per
    # step even for multi-MiB DMA blocks.
    b_tile, C, hw_tile = pred_ref.shape
    cch = min(C, 16)
    lch = max(128, _round_down(8192 // cch, 128))
    for b in range(b_tile):
        for j0 in range(0, hw_tile, lch):
            j1 = min(j0 + lch, hw_tile)
            acc = jnp.zeros((1, j1 - j0), jnp.float32)
            for c0 in range(0, C, cch):
                c1 = min(c0 + cch, C)
                p = pred_ref[b, c0:c1, j0:j1].astype(jnp.float32)
                t = targ_ref[b, c0:c1, j0:j1].astype(jnp.float32)
                acc = acc + jnp.sum(t * jnp.log(p + _EPS), axis=0, keepdims=True)
            out_ref[b, :, j0:j1] = (-acc).astype(out_ref.dtype)


# ---------------------------------------------------------------------------
# Wrapper
# ---------------------------------------------------------------------------
@functools.partial(jax.jit, static_argnames=("reduction",))
def nll_loss(prediction, target, reduction="mean"):
    """Pallas implementation of util/losses.py::NLL.forward (no mask)."""
    # TODO(synk): optional `mask` kwarg (masked loss + mask-normalized mean) is
    # not implemented.
    shape = prediction.shape
    B, C = shape[0], shape[1]
    spatial = tuple(shape[2:])
    HW = int(math.prod(spatial)) if spatial else 1
    itemsize = jnp.dtype(prediction.dtype).itemsize
    big = _big_vmem_tier()

    if reduction == "none":
        out_dtype = jnp.promote_types(prediction.dtype, target.dtype)
        budget = 2 << 20                              # bytes / input / grid step
        max_elems = max(1, budget // itemsize)
        hw_pad = _round_up(HW, 128)
        pred3 = prediction.reshape(B, C, HW)
        targ3 = target.reshape(B, C, HW)
        if C * hw_pad <= max_elems or HW <= 128:
            # Whole spatial extent per block; fold batch up to the byte budget.
            hw_tile = HW
            b_tile = min(B, max(1, max_elems // max(1, C * hw_pad)), 256)
        else:
            b_tile = 1
            hw_tile = min(HW, max(128, _round_down(max_elems // C, 128)))
        n_b = pl.cdiv(B, b_tile)
        n_hw = pl.cdiv(HW, hw_tile)
        out = pl.pallas_call(
            _nll_none_kernel,
            out_shape=jax.ShapeDtypeStruct((B, 1, HW), out_dtype),
            grid_spec=pltpu.PrefetchScalarGridSpec(
                num_scalar_prefetch=0,
                grid=(n_b, n_hw),
                in_specs=[
                    pl.BlockSpec((b_tile, C, hw_tile), lambda b, t: (b, 0, t)),
                    pl.BlockSpec((b_tile, C, hw_tile), lambda b, t: (b, 0, t)),
                ],
                out_specs=pl.BlockSpec((b_tile, 1, hw_tile), lambda b, t: (b, 0, t)),
            ),
            compiler_params=pltpu.CompilerParams(
                dimension_semantics=("parallel", "parallel")),
        )(pred3, targ3)
        return out.reshape((B, 1) + spatial)

    # ----------- 'mean' / 'sum': streaming partial-sum reduction ------------
    N = B * C * HW
    budget = (4 << 20) if big else (2 << 20)          # bytes / input / grid step

    if N % _LANE == 0:
        # Lane-dense slab (free reshape).  Use 128 lanes for tiny N so rows >= 8.
        cols = _LANE if (N // _LANE) >= 8 else 128
        rows = N // cols
        pred2 = prediction.reshape(rows, cols)
        targ2 = target.reshape(rows, cols)
    elif 8 * _round_up(HW, 128) * itemsize <= budget:
        # Free reshape to (B*C, HW): ragged lane width is a full-extent last
        # dim, ragged row blocks are masked in-kernel -> no padding copy.
        rows, cols = B * C, HW
        pred2 = prediction.reshape(rows, cols)
        targ2 = target.reshape(rows, cols)
    else:
        # Pathological (non-lane-aligned N with a huge spatial extent): fall
        # back to one padding copy.  Rare.
        rows = pl.cdiv(N, _LANE)
        cols = _LANE
        pad = rows * _LANE - N
        pred2 = jnp.pad(prediction.reshape(-1), (0, pad)).reshape(rows, cols)
        # target padded with 0 -> padded elements contribute exactly 0.
        targ2 = jnp.pad(target.reshape(-1), (0, pad)).reshape(rows, cols)

    cols_pad = _round_up(cols, 128)
    if rows >= 8:
        cap = max(8, _round_down(budget // (cols_pad * itemsize), 8))
        # >= 2 blocks whenever possible so the 'parallel' axis can shard across
        # both TensorCores on v7x (negligible cost on single-TC chips).
        n_blocks = max(pl.cdiv(rows, cap), 2 if rows >= 16 else 1)
        tile_r = min(cap, _round_up(pl.cdiv(rows, n_blocks), 8),
                     _round_down(rows, 8))
        n_blocks = pl.cdiv(rows, tile_r)
        out_rows = 8
    else:
        tile_r = rows                                  # single full-extent block
        n_blocks = 1
        out_rows = rows
    need_mask = (n_blocks * tile_r != rows)
    out_lanes = 128 if cols % 128 == 0 else 1

    partials = pl.pallas_call(
        functools.partial(_nll_partial_sum_kernel,
                          rows_total=rows, need_mask=need_mask),
        out_shape=jax.ShapeDtypeStruct((n_blocks * out_rows, out_lanes),
                                       jnp.float32),
        grid_spec=pltpu.PrefetchScalarGridSpec(
            num_scalar_prefetch=0,
            grid=(n_blocks,),
            in_specs=[
                pl.BlockSpec((tile_r, cols), lambda i: (i, 0)),
                pl.BlockSpec((tile_r, cols), lambda i: (i, 0)),
            ],
            out_specs=pl.BlockSpec((out_rows, out_lanes), lambda i: (i, 0)),
        ),
        compiler_params=pltpu.CompilerParams(
            dimension_semantics=("parallel",)),
    )(pred2, targ2)

    total = jnp.sum(partials)                          # tiny final reduction
    if reduction == "sum":
        return -total
    # 'mean': mean over the channel-summed (B, 1, *spatial) map.
    return -total / jnp.float32(B * HW)


# ---------------------------------------------------------------------------
# Pure-JAX reference (mirrors the PyTorch forward)
# ---------------------------------------------------------------------------
def nll_ref(prediction, target, reduction="mean"):
    loss = target * jnp.log(prediction + _EPS)
    loss = jnp.sum(loss, axis=1, keepdims=True)
    if reduction == "none":
        return -loss
    if reduction == "sum":
        return -jnp.sum(loss)
    return -jnp.mean(loss)


if __name__ == "__main__":
    key = jax.random.PRNGKey(0)

    def make_inputs(shape, k):
        kp, kt = jax.random.split(k)
        pred = jax.nn.softmax(jax.random.normal(kp, shape, jnp.float32), axis=1)
        targ = jax.nn.softmax(jax.random.normal(kt, shape, jnp.float32), axis=1)
        return pred, targ

    keys = jax.random.split(key, 4)

    # Shape 1: small, lane-aligned total size (2*4*256 = 2048 elements).
    pred, targ = make_inputs((2, 4, 16, 16), keys[0])
    out = jax.block_until_ready(nll_loss(pred, targ, reduction="mean"))
    assert jnp.allclose(out, nll_ref(pred, targ, "mean"), rtol=1e-4, atol=1e-4)
    out = jax.block_until_ready(nll_loss(pred, targ, reduction="sum"))
    assert jnp.allclose(out, nll_ref(pred, targ, "sum"), rtol=1e-4, atol=1e-4)
    out = jax.block_until_ready(nll_loss(pred, targ, reduction="none"))
    assert out.shape == (2, 1, 16, 16)
    assert jnp.allclose(out, nll_ref(pred, targ, "none"), rtol=1e-5, atol=1e-5)

    # Shape 2: non-128-aligned spatial dims (exercises the no-pad masked path).
    pred, targ = make_inputs((2, 5, 10, 10), keys[1])
    out = jax.block_until_ready(nll_loss(pred, targ, reduction="mean"))
    assert jnp.allclose(out, nll_ref(pred, targ, "mean"), rtol=1e-4, atol=1e-4)
    out = jax.block_until_ready(nll_loss(pred, targ, reduction="sum"))
    assert jnp.allclose(out, nll_ref(pred, targ, "sum"), rtol=1e-4, atol=1e-4)
    out = jax.block_until_ready(nll_loss(pred, targ, reduction="none"))
    assert out.shape == (2, 1, 10, 10)
    assert jnp.allclose(out, nll_ref(pred, targ, "none"), rtol=1e-5, atol=1e-5)

    # Shape 3: lane-aligned, multi-block grid (exercises lane-group folding).
    pred, targ = make_inputs((4, 8, 64, 96), keys[2])
    out = jax.block_until_ready(nll_loss(pred, targ, reduction="mean"))
    assert jnp.allclose(out, nll_ref(pred, targ, "mean"), rtol=1e-4, atol=1e-4)
    out = jax.block_until_ready(nll_loss(pred, targ, reduction="sum"))
    assert jnp.allclose(out, nll_ref(pred, targ, "sum"), rtol=1e-4, atol=1e-4)

    # Shape 4: odd channels / odd spatial (masked row blocks + ragged lanes).
    pred, targ = make_inputs((3, 7, 33, 35), keys[3])
    out = jax.block_until_ready(nll_loss(pred, targ, reduction="sum"))
    assert jnp.allclose(out, nll_ref(pred, targ, "sum"), rtol=1e-4, atol=1e-4)
    out = jax.block_until_ready(nll_loss(pred, targ, reduction="none"))
    assert out.shape == (3, 1, 33, 35)
    assert jnp.allclose(out, nll_ref(pred, targ, "none"), rtol=1e-5, atol=1e-5)

    print("KERNEL_OK")
</pallas_src>

<mosaic_0001>
module attributes {stable_mosaic.version = 11 : i64} {
  func.func @_nll_partial_sum_kernel(%arg0: i32, %arg1: memref<8x128xf32, #tpu.memory_space<vmem>>, %arg2: memref<8x128xf32, #tpu.memory_space<vmem>>, %arg3: memref<8x128xf32, #tpu.memory_space<vmem>>) attributes {dimension_semantics = [#tpu.dimension_semantics<parallel>], iteration_bounds = array<i64: 2>, scalar_prefetch = 0 : i64, scratch_operands = 0 : i64, tpu.core_type = #tpu.core_type<tc>, window_params = [{transform_indices = @transform_0, window_bounds = array<i64: 8, 128>}, {transform_indices = @transform_1, window_bounds = array<i64: 8, 128>}, {transform_indices = @transform_2, window_bounds = array<i64: 8, 128>}]} {
    %cst = arith.constant 0.000000e+00 : f32
    %0 = vector.broadcast %cst : f32 to vector<8x128xf32>
    %c0 = arith.constant 0 : index
    %c0_0 = arith.constant 0 : index
    %1 = vector.load %arg1[%c0, %c0_0] : memref<8x128xf32, #tpu.memory_space<vmem>>, vector<8x128xf32>
    %c0_1 = arith.constant 0 : index
    %c0_2 = arith.constant 0 : index
    %2 = vector.load %arg2[%c0_1, %c0_2] : memref<8x128xf32, #tpu.memory_space<vmem>>, vector<8x128xf32>
    %cst_3 = arith.constant 9.99999974E-6 : f32
    %3 = vector.broadcast %cst_3 : f32 to vector<8x128xf32>
    %4 = arith.addf %1, %3 : vector<8x128xf32>
    %5 = math.log %4 : vector<8x128xf32>
    %6 = arith.mulf %2, %5 : vector<8x128xf32>
    %7 = arith.addf %0, %6 : vector<8x128xf32>
    %c0_4 = arith.constant 0 : index
    %c0_5 = arith.constant 0 : index
    %8 = vector.load %arg3[%c0_4, %c0_5] : memref<8x128xf32, #tpu.memory_space<vmem>>, vector<8x128xf32>
    tpu.vector_store %arg3[%c0_4, %c0_5], %7 {strides = array<i32>} : memref<8x128xf32, #tpu.memory_space<vmem>>, vector<8x128xf32>,
    return
  }
  func.func @transform_0(%arg0: i32) -> (i32, i32) {
    %c0_i32 = arith.constant 0 : i32
    %c0_i32_0 = arith.constant 0 : i32
    return %arg0, %c0_i32 : i32, i32
  }
  func.func @transform_1(%arg0: i32) -> (i32, i32) {
    %c0_i32 = arith.constant 0 : i32
    %c0_i32_0 = arith.constant 0 : i32
    return %arg0, %c0_i32 : i32, i32
  }
  func.func @transform_2(%arg0: i32) -> (i32, i32) {
    %c0_i32 = arith.constant 0 : i32
    %c0_i32_0 = arith.constant 0 : i32
    return %arg0, %c0_i32 : i32, i32
  }
}

</mosaic_0001>

<bundles_post_ra>
// kernel: nll_loss.1
= control target key start
LH: loop header
LB: loop body
LE: loop exit
PB: predicated region body
PF: predicated region fallthrough
CT: control target
= control target key end

     0   :  { %s253_s9 = smov 0   ;;  %s281_s0 = inlined_call_operand.vmem [shape: f32[16,128], index: 0, kind: input, shape index: {}]   ;;  %s282_s1 = inlined_call_operand.vmem [shape: f32[16,128], index: 1, kind: input, shape index: {}]   ;;  %s283_s2 = inlined_call_operand.vmem [shape: f32[16,128], index: 2, kind: output, shape index: {}]  }
   0x1 LB: > { %s229_s10 = sadd.s32 4294967295, %s255_s9   ;;  %p233_p0 = scmp.ge.s32.totalorder %s255_s9, 1  ;;  %s255_s9 = sphi %s253_s9, %s12_s9  }
   0x2   : > { %p120_p1 = scmp.lt.s32.totalorder %s255_s9, 3 }
   0x4   : > { %p121_p2 = pnand %p233_p0, %p120_p1 }
   0x5   : > { %p144_p3 = scmp.lt.s32.totalorder (!%p121_p2), %s229_s10, 1 }
   0x6   : > { %124 = sbr.rel (%p121_p2) target bundleno = 35 (0x23), region = 28 }
   0xd   : > { %s285_s10 = smov (!%p144_p3, %s229_s10), 1 }
   0xe   : > { %s234_s11 = sshll.u32 %s285_s10, 3 }
   0xf   : > { %s147_s14 = scalar_lea.vmem %s281_s0, %s234_s11  ;;  %s151_s17 = scalar_lea.vmem %s282_s1, %s234_s11 }
  0x10   : > { %v156_v0 = vld [vmem:[%s147_s14] sm:$0xff]  ;;  %s155_s20 = scalar_lea.vmem %s283_s2, %s234_s11 }
  0x11   : > { %v158_v1 = vadd.f32 1e-05, %v156_v0  ;;  %v157_v3 = vld [vmem:[%s151_s17] sm:$0xff] }
  0x13   : > { %247 = vlog2.f32 %v158_v1 }
  0x1d   : > { %v248_v2 = vpop.eup %247 }
  0x1e   : > { %v160_v4 = vmul.f32 0.6931472, %v248_v2 }
  0x20   : > { %v161_v5 = vmul.f32 %v160_v4, %v157_v3 }
  0x22   : > { %163 = vst [vmem:[%s155_s20] sm:$0xff] %v161_v5 }
  0x23 PF: > { %s12_s9 = sadd.s32 1, %s255_s9  }
  0x24   : > { %p9_p4 = scmp.ge.s32.totalorder %s12_s9, 4  }
  0x26   :  { %11 = sbr.rel (!%p9_p4) target bundleno = 1 (0x1), region = 61 }

</bundles_post_ra>
